<compile_context>
chip_gen: v5e
topology: v5e:2x2
jax: 0.10.0
libtpu: 0.0.40
codegen_flags: <defaults>
</compile_context>

<pallas_src>
import math

import jax
import jax.numpy as jnp
from jax.experimental import pallas as pl
from jax.experimental.pallas import tpu as pltpu


# ----------------------------- Pallas kernel --------------------------------
def _diffusion_embedding_kernel(steps_ref,            # SMEM (B,) int32 (scalar prefetch)
                                table_ref,            # VMEM (T_pad, E) f32
                                w1_ref, b1_ref,       # VMEM (E, P) bf16, (1, P) f32
                                w2_ref, b2_ref,       # VMEM (P, P) bf16, (1, P) f32
                                o_ref,                # VMEM (B, P) f32
                                x_scratch):           # VMEM (B, E) f32 scratch
    B = x_scratch.shape[0]

    # Fused gather: one dynamic-sublane row load per batch element (B is small
    # and static, so this unrolls into B vld/vst pairs inside VMEM).
    for i in range(B):
        x_scratch[pl.ds(i, 1), :] = table_ref[pl.ds(steps_ref[i], 1), :]

    x = x_scratch[...]                                                  # (B, E) f32

    # Linear1 + SiLU  (bf16 operands into the MXU, f32 accumulate / VPU math)
    h = jnp.dot(x.astype(jnp.bfloat16), w1_ref[...],
                preferred_element_type=jnp.float32) + b1_ref[...]
    h = h * pl.reciprocal(1.0 + jnp.exp(-h), approx=True)               # SiLU on EUP

    # Linear2 + SiLU
    y = jnp.dot(h.astype(jnp.bfloat16), w2_ref[...],
                preferred_element_type=jnp.float32) + b2_ref[...]
    y = y * pl.reciprocal(1.0 + jnp.exp(-y), approx=True)               # SiLU on EUP

    o_ref[...] = y.astype(o_ref.dtype)


def diffusion_embedding_forward(diffusion_step, table, w1, b1, w2, b2):
    """diffusion_step: (B,) int; table: (T, E) f32; w1: (E, P) bf16; b1: (1, P) f32;
       w2: (P, P) bf16; b2: (1, P) f32  ->  (B, P) f32."""
    B = diffusion_step.shape[0]
    T, E = table.shape
    P = w1.shape[1]

    # Pad the table's row count to a multiple of 8 sublanes; valid step indices
    # are always < T, so the zero pad rows are never read.
    T_pad = ((T + 7) // 8) * 8
    if T_pad != T:
        table = jnp.pad(table, ((0, T_pad - T), (0, 0)))

    # Pad the batch to a multiple of 8 sublanes; padded entries gather row 0
    # (always valid) and are sliced off below.
    B_pad = ((B + 7) // 8) * 8
    steps = diffusion_step.astype(jnp.int32)
    if B_pad != B:
        steps = jnp.pad(steps, (0, B_pad - B))

    grid_spec = pltpu.PrefetchScalarGridSpec(
        num_scalar_prefetch=1,                 # steps -> SMEM, fused in-kernel gather
        grid=(1,),
        in_specs=[
            pl.BlockSpec((T_pad, E), lambda i, steps: (0, 0)),   # sin/cos table (f32)
            pl.BlockSpec((E, P),     lambda i, steps: (0, 0)),   # w1 (bf16)
            pl.BlockSpec((1, P),     lambda i, steps: (0, 0)),   # b1 (f32)
            pl.BlockSpec((P, P),     lambda i, steps: (0, 0)),   # w2 (bf16)
            pl.BlockSpec((1, P),     lambda i, steps: (0, 0)),   # b2 (f32)
        ],
        out_specs=pl.BlockSpec((B_pad, P), lambda i, steps: (0, 0)),
        scratch_shapes=[pltpu.VMEM((B_pad, E), jnp.float32)],
    )

    out = pl.pallas_call(
        _diffusion_embedding_kernel,
        out_shape=jax.ShapeDtypeStruct((B_pad, P), jnp.float32),
        grid_spec=grid_spec,
        compiler_params=pltpu.CompilerParams(
            dimension_semantics=("arbitrary",)),
    )(steps, table, w1, b1, w2, b2)

    return out[:B] if B_pad != B else out


# ------------------------ module setup (plain JAX glue) ----------------------
def build_embedding_table(num_steps, half_dim):
    """Matches DiffusionEmbedding._build_embedding(num_steps, embedding_dim/2)."""
    steps = jnp.arange(num_steps, dtype=jnp.float32)[:, None]            # (T, 1)
    frequencies = 10.0 ** (jnp.arange(half_dim, dtype=jnp.float32)
                           / (half_dim - 1) * 4.0)[None, :]              # (1, d)
    table = steps * frequencies                                          # (T, d)
    return jnp.concatenate([jnp.sin(table), jnp.cos(table)], axis=1)     # (T, 2d)


def init_params(key, embedding_dim, projection_dim):
    """nn.Linear-style init; weights stored transposed as (in, out), bf16."""
    k1, k2, k3, k4 = jax.random.split(key, 4)
    bound1 = 1.0 / math.sqrt(embedding_dim)
    bound2 = 1.0 / math.sqrt(projection_dim)
    w1 = jax.random.uniform(k1, (embedding_dim, projection_dim),
                            minval=-bound1, maxval=bound1,
                            dtype=jnp.float32).astype(jnp.bfloat16)
    b1 = jax.random.uniform(k2, (1, projection_dim),
                            minval=-bound1, maxval=bound1, dtype=jnp.float32)
    w2 = jax.random.uniform(k3, (projection_dim, projection_dim),
                            minval=-bound2, maxval=bound2,
                            dtype=jnp.float32).astype(jnp.bfloat16)
    b2 = jax.random.uniform(k4, (1, projection_dim),
                            minval=-bound2, maxval=bound2, dtype=jnp.float32)
    return w1, b1, w2, b2


# ----------------------------------- main ------------------------------------
if __name__ == "__main__":
    num_steps = 50
    embedding_dim = 128
    projection_dim = 128
    batch = 8

    key = jax.random.PRNGKey(0)
    k_step, k_params = jax.random.split(key)

    table = build_embedding_table(num_steps, embedding_dim // 2)   # (50, 128) f32
    w1, b1, w2, b2 = init_params(k_params, embedding_dim, projection_dim)

    diffusion_step = jax.random.randint(k_step, (batch,), 0, num_steps)

    out = diffusion_embedding_forward(diffusion_step, table, w1, b1, w2, b2)
    out = jax.block_until_ready(out)

    # pure-JAX reference (same bf16 weights up-cast to f32, exact sigmoid);
    # tolerance covers bf16 activation cast + approx reciprocal.
    x_ref = table[diffusion_step]
    h_ref = jax.nn.silu(x_ref @ w1.astype(jnp.float32) + b1)
    y_ref = jax.nn.silu(h_ref @ w2.astype(jnp.float32) + b2)
    assert out.shape == (batch, projection_dim)
    assert jnp.allclose(out, y_ref, atol=2e-2, rtol=2e-2), (
        float(jnp.max(jnp.abs(out - y_ref))))

    print("KERNEL_OK")
</pallas_src>

<mosaic_0001>
module attributes {stable_mosaic.version = 11 : i64} {
  func.func @_diffusion_embedding_kernel(%arg0: i32, %arg1: memref<8xi32, #tpu.memory_space<smem>>, %arg2: memref<56x128xf32, #tpu.memory_space<vmem>>, %arg3: memref<128x128xbf16, #tpu.memory_space<vmem>>, %arg4: memref<1x128xf32, #tpu.memory_space<vmem>>, %arg5: memref<128x128xbf16, #tpu.memory_space<vmem>>, %arg6: memref<1x128xf32, #tpu.memory_space<vmem>>, %arg7: memref<8x128xf32, #tpu.memory_space<vmem>>, %arg8: memref<8x128xf32, #tpu.memory_space<vmem>>) attributes {dimension_semantics = [#tpu.dimension_semantics<arbitrary>], iteration_bounds = array<i64: 1>, scalar_prefetch = 1 : i64, scratch_operands = 1 : i64, tpu.core_type = #tpu.core_type<tc>, window_params = [{pipeline_mode = #tpu.pipeline_mode<synchronous>, transform_indices = @transform_0, window_bounds = array<i64: 56, 128>}, {pipeline_mode = #tpu.pipeline_mode<synchronous>, transform_indices = @transform_1, window_bounds = array<i64: 128, 128>}, {pipeline_mode = #tpu.pipeline_mode<synchronous>, transform_indices = @transform_2, window_bounds = array<i64: 1, 128>}, {pipeline_mode = #tpu.pipeline_mode<synchronous>, transform_indices = @transform_3, window_bounds = array<i64: 128, 128>}, {pipeline_mode = #tpu.pipeline_mode<synchronous>, transform_indices = @transform_4, window_bounds = array<i64: 1, 128>}, {pipeline_mode = #tpu.pipeline_mode<synchronous>, transform_indices = @transform_5, window_bounds = array<i64: 8, 128>}]} {
    %c0 = arith.constant 0 : index
    %0 = memref.load %arg1[%c0] : memref<8xi32, #tpu.memory_space<smem>>
    %1 = arith.index_cast %0 : i32 to index
    %c0_0 = arith.constant 0 : index
    %2 = vector.load %arg2[%1, %c0_0] : memref<56x128xf32, #tpu.memory_space<vmem>>, vector<1x128xf32>
    %c0_1 = arith.constant 0 : index
    %c0_2 = arith.constant 0 : index
    %3 = vector.load %arg8[%c0_1, %c0_2] : memref<8x128xf32, #tpu.memory_space<vmem>>, vector<1x128xf32>
    tpu.vector_store %arg8[%c0_1, %c0_2], %2 {strides = array<i32>} : memref<8x128xf32, #tpu.memory_space<vmem>>, vector<1x128xf32>,
    %c1 = arith.constant 1 : index
    %4 = memref.load %arg1[%c1] : memref<8xi32, #tpu.memory_space<smem>>
    %5 = arith.index_cast %4 : i32 to index
    %c0_3 = arith.constant 0 : index
    %6 = vector.load %arg2[%5, %c0_3] : memref<56x128xf32, #tpu.memory_space<vmem>>, vector<1x128xf32>
    %c1_4 = arith.constant 1 : index
    %c0_5 = arith.constant 0 : index
    %7 = vector.load %arg8[%c1_4, %c0_5] : memref<8x128xf32, #tpu.memory_space<vmem>>, vector<1x128xf32>
    tpu.vector_store %arg8[%c1_4, %c0_5], %6 {strides = array<i32>} : memref<8x128xf32, #tpu.memory_space<vmem>>, vector<1x128xf32>,
    %c2 = arith.constant 2 : index
    %8 = memref.load %arg1[%c2] : memref<8xi32, #tpu.memory_space<smem>>
    %9 = arith.index_cast %8 : i32 to index
    %c0_6 = arith.constant 0 : index
    %10 = vector.load %arg2[%9, %c0_6] : memref<56x128xf32, #tpu.memory_space<vmem>>, vector<1x128xf32>
    %c2_7 = arith.constant 2 : index
    %c0_8 = arith.constant 0 : index
    %11 = vector.load %arg8[%c2_7, %c0_8] : memref<8x128xf32, #tpu.memory_space<vmem>>, vector<1x128xf32>
    tpu.vector_store %arg8[%c2_7, %c0_8], %10 {strides = array<i32>} : memref<8x128xf32, #tpu.memory_space<vmem>>, vector<1x128xf32>,
    %c3 = arith.constant 3 : index
    %12 = memref.load %arg1[%c3] : memref<8xi32, #tpu.memory_space<smem>>
    %13 = arith.index_cast %12 : i32 to index
    %c0_9 = arith.constant 0 : index
    %14 = vector.load %arg2[%13, %c0_9] : memref<56x128xf32, #tpu.memory_space<vmem>>, vector<1x128xf32>
    %c3_10 = arith.constant 3 : index
    %c0_11 = arith.constant 0 : index
    %15 = vector.load %arg8[%c3_10, %c0_11] : memref<8x128xf32, #tpu.memory_space<vmem>>, vector<1x128xf32>
    tpu.vector_store %arg8[%c3_10, %c0_11], %14 {strides = array<i32>} : memref<8x128xf32, #tpu.memory_space<vmem>>, vector<1x128xf32>,
    %c4 = arith.constant 4 : index
    %16 = memref.load %arg1[%c4] : memref<8xi32, #tpu.memory_space<smem>>
    %17 = arith.index_cast %16 : i32 to index
    %c0_12 = arith.constant 0 : index
    %18 = vector.load %arg2[%17, %c0_12] : memref<56x128xf32, #tpu.memory_space<vmem>>, vector<1x128xf32>
    %c4_13 = arith.constant 4 : index
    %c0_14 = arith.constant 0 : index
    %19 = vector.load %arg8[%c4_13, %c0_14] : memref<8x128xf32, #tpu.memory_space<vmem>>, vector<1x128xf32>
    tpu.vector_store %arg8[%c4_13, %c0_14], %18 {strides = array<i32>} : memref<8x128xf32, #tpu.memory_space<vmem>>, vector<1x128xf32>,
    %c5 = arith.constant 5 : index
    %20 = memref.load %arg1[%c5] : memref<8xi32, #tpu.memory_space<smem>>
    %21 = arith.index_cast %20 : i32 to index
    %c0_15 = arith.constant 0 : index
    %22 = vector.load %arg2[%21, %c0_15] : memref<56x128xf32, #tpu.memory_space<vmem>>, vector<1x128xf32>
    %c5_16 = arith.constant 5 : index
    %c0_17 = arith.constant 0 : index
    %23 = vector.load %arg8[%c5_16, %c0_17] : memref<8x128xf32, #tpu.memory_space<vmem>>, vector<1x128xf32>
    tpu.vector_store %arg8[%c5_16, %c0_17], %22 {strides = array<i32>} : memref<8x128xf32, #tpu.memory_space<vmem>>, vector<1x128xf32>,
    %c6 = arith.constant 6 : index
    %24 = memref.load %arg1[%c6] : memref<8xi32, #tpu.memory_space<smem>>
    %25 = arith.index_cast %24 : i32 to index
    %c0_18 = arith.constant 0 : index
    %26 = vector.load %arg2[%25, %c0_18] : memref<56x128xf32, #tpu.memory_space<vmem>>, vector<1x128xf32>
    %c6_19 = arith.constant 6 : index
    %c0_20 = arith.constant 0 : index
    %27 = vector.load %arg8[%c6_19, %c0_20] : memref<8x128xf32, #tpu.memory_space<vmem>>, vector<1x128xf32>
    tpu.vector_store %arg8[%c6_19, %c0_20], %26 {strides = array<i32>} : memref<8x128xf32, #tpu.memory_space<vmem>>, vector<1x128xf32>,
    %c7 = arith.constant 7 : index
    %28 = memref.load %arg1[%c7] : memref<8xi32, #tpu.memory_space<smem>>
    %29 = arith.index_cast %28 : i32 to index
    %c0_21 = arith.constant 0 : index
    %30 = vector.load %arg2[%29, %c0_21] : memref<56x128xf32, #tpu.memory_space<vmem>>, vector<1x128xf32>
    %c7_22 = arith.constant 7 : index
    %c0_23 = arith.constant 0 : index
    %31 = vector.load %arg8[%c7_22, %c0_23] : memref<8x128xf32, #tpu.memory_space<vmem>>, vector<1x128xf32>
    tpu.vector_store %arg8[%c7_22, %c0_23], %30 {strides = array<i32>} : memref<8x128xf32, #tpu.memory_space<vmem>>, vector<1x128xf32>,
    %c0_24 = arith.constant 0 : index
    %c0_25 = arith.constant 0 : index
    %32 = vector.load %arg8[%c0_24, %c0_25] : memref<8x128xf32, #tpu.memory_space<vmem>>, vector<8x128xf32>
    %33 = arith.truncf %32 : vector<8x128xf32> to vector<8x128xbf16>
    %c0_26 = arith.constant 0 : index
    %c0_27 = arith.constant 0 : index
    %34 = vector.load %arg3[%c0_26, %c0_27] : memref<128x128xbf16, #tpu.memory_space<vmem>>, vector<128x128xbf16>
    %cst = arith.constant dense<0.000000e+00> : vector<8x128xf32>
    %35 = tpu.matmul %33, %34, %cst {dimension_numbers = #tpu.dot_dimension_numbers<[1], [0], [0], [1], [0, 0, 1, 1], [], []>} : vector<8x128xbf16>, vector<128x128xbf16>, vector<8x128xf32> -> vector<8x128xf32>
    %c0_28 = arith.constant 0 : index
    %c0_29 = arith.constant 0 : index
    %36 = vector.load %arg4[%c0_28, %c0_29] : memref<1x128xf32, #tpu.memory_space<vmem>>, vector<1x128xf32>
    %37 = vector.broadcast %36 : vector<1x128xf32> to vector<8x128xf32>
    %38 = arith.addf %35, %37 : vector<8x128xf32>
    %cst_30 = arith.constant 0.000000e+00 : f32
    %39 = vector.broadcast %cst_30 : f32 to vector<8x128xf32>
    %40 = arith.subf %39, %38 : vector<8x128xf32>
    %41 = math.exp %40 : vector<8x128xf32>
    %cst_31 = arith.constant 1.000000e+00 : f32
    %42 = vector.broadcast %cst_31 : f32 to vector<8x128xf32>
    %43 = arith.addf %42, %41 : vector<8x128xf32>
    %44 = tpu.reciprocal %43 {approx = true} : vector<8x128xf32> -> vector<8x128xf32>
    %45 = arith.mulf %38, %44 : vector<8x128xf32>
    %46 = arith.truncf %45 : vector<8x128xf32> to vector<8x128xbf16>
    %c0_32 = arith.constant 0 : index
    %c0_33 = arith.constant 0 : index
    %47 = vector.load %arg5[%c0_32, %c0_33] : memref<128x128xbf16, #tpu.memory_space<vmem>>, vector<128x128xbf16>
    %cst_34 = arith.constant dense<0.000000e+00> : vector<8x128xf32>
    %48 = tpu.matmul %46, %47, %cst_34 {dimension_numbers = #tpu.dot_dimension_numbers<[1], [0], [0], [1], [0, 0, 1, 1], [], []>} : vector<8x128xbf16>, vector<128x128xbf16>, vector<8x128xf32> -> vector<8x128xf32>
    %c0_35 = arith.constant 0 : index
    %c0_36 = arith.constant 0 : index
    %49 = vector.load %arg6[%c0_35, %c0_36] : memref<1x128xf32, #tpu.memory_space<vmem>>, vector<1x128xf32>
    %50 = vector.broadcast %49 : vector<1x128xf32> to vector<8x128xf32>
    %51 = arith.addf %48, %50 : vector<8x128xf32>
    %cst_37 = arith.constant 0.000000e+00 : f32
    %52 = vector.broadcast %cst_37 : f32 to vector<8x128xf32>
    %53 = arith.subf %52, %51 : vector<8x128xf32>
    %54 = math.exp %53 : vector<8x128xf32>
    %cst_38 = arith.constant 1.000000e+00 : f32
    %55 = vector.broadcast %cst_38 : f32 to vector<8x128xf32>
    %56 = arith.addf %55, %54 : vector<8x128xf32>
    %57 = tpu.reciprocal %56 {approx = true} : vector<8x128xf32> -> vector<8x128xf32>
    %58 = arith.mulf %51, %57 : vector<8x128xf32>
    %c0_39 = arith.constant 0 : index
    %c0_40 = arith.constant 0 : index
    %59 = vector.load %arg7[%c0_39, %c0_40] : memref<8x128xf32, #tpu.memory_space<vmem>>, vector<8x128xf32>
    tpu.vector_store %arg7[%c0_39, %c0_40], %58 {strides = array<i32>} : memref<8x128xf32, #tpu.memory_space<vmem>>, vector<8x128xf32>,
    return
  }
  func.func @transform_0(%arg0: i32, %arg1: memref<8xi32, #tpu.memory_space<smem>>) -> (i32, i32) {
    %c0_i32 = arith.constant 0 : i32
    %c0_i32_0 = arith.constant 0 : i32
    %c0_i32_1 = arith.constant 0 : i32
    return %c0_i32, %c0_i32_0 : i32, i32
  }
  func.func @transform_1(%arg0: i32, %arg1: memref<8xi32, #tpu.memory_space<smem>>) -> (i32, i32) {
    %c0_i32 = arith.constant 0 : i32
    %c0_i32_0 = arith.constant 0 : i32
    %c0_i32_1 = arith.constant 0 : i32
    return %c0_i32, %c0_i32_0 : i32, i32
  }
  func.func @transform_2(%arg0: i32, %arg1: memref<8xi32, #tpu.memory_space<smem>>) -> (i32, i32) {
    %c0_i32 = arith.constant 0 : i32
    %c0_i32_0 = arith.constant 0 : i32
    %c0_i32_1 = arith.constant 0 : i32
    return %c0_i32, %c0_i32_0 : i32, i32
  }
  func.func @transform_3(%arg0: i32, %arg1: memref<8xi32, #tpu.memory_space<smem>>) -> (i32, i32) {
    %c0_i32 = arith.constant 0 : i32
    %c0_i32_0 = arith.constant 0 : i32
    %c0_i32_1 = arith.constant 0 : i32
    return %c0_i32, %c0_i32_0 : i32, i32
  }
  func.func @transform_4(%arg0: i32, %arg1: memref<8xi32, #tpu.memory_space<smem>>) -> (i32, i32) {
    %c0_i32 = arith.constant 0 : i32
    %c0_i32_0 = arith.constant 0 : i32
    %c0_i32_1 = arith.constant 0 : i32
    return %c0_i32, %c0_i32_0 : i32, i32
  }
  func.func @transform_5(%arg0: i32, %arg1: memref<8xi32, #tpu.memory_space<smem>>) -> (i32, i32) {
    %c0_i32 = arith.constant 0 : i32
    %c0_i32_0 = arith.constant 0 : i32
    %c0_i32_1 = arith.constant 0 : i32
    return %c0_i32, %c0_i32_0 : i32, i32
  }
}

</mosaic_0001>

<bundles_post_ra>
// kernel: tpu_custom_call.1
= control target key start
LH: loop header
LB: loop body
LE: loop exit
PB: predicated region body
PF: predicated region fallthrough
CT: control target
= control target key end

     0   :  { %s535_s24 = smov [#allocation4]   ;;  %s603_s0 = inlined_call_operand.hbm [shape: s32[8], index: 0, kind: input, shape index: {}]   ;;  %s604_s1 = inlined_call_operand.hbm [shape: f32[56,128], index: 1, kind: input, shape index: {}]   ;;  %s605_s2 = inlined_call_operand.hbm [shape: bf16[128,128], index: 2, kind: input, shape index: {}]   ;;  %s606_s3 = inlined_call_operand.vmem [shape: f32[1,128], index: 3, kind: input, shape index: {}]   ;;  %s607_s4 = inlined_call_operand.hbm [shape: bf16[128,128], index: 4, kind: input, shape index: {}]   ;;  %s608_s5 = inlined_call_operand.vmem [shape: f32[1,128], index: 5, kind: input, shape index: {}]   ;;  %s609_s6 = inlined_call_operand.hbm [shape: f32[8,128], index: 6, kind: output, shape index: {}]  }
   0x1   :  { %s12_s23 = sshll.u32 %s603_s0, 4  ;;  %s13_s23 = int_to_ptr.hbm [resolvable:$true] %s12_s23 }
   0x2   :  { %15 = dma.hbm_to_smem %s13_s23, 16, %s535_s24, [#allocation3] }
   0x3   :  { %527 = dma.done.wait [#allocation3], 16 }
   0x4   :  { %528 = vsyncadd [#allocation3], 4294967280 }
   0x5   :  { %18 = sfence }
   0x6   :  { %19 = vsyncpa [#allocation6], 0 }
   0x7   :  { %20 = vsyncpa [#allocation9], 0  ;;  %s39_s27 = sshll.u32 %s605_s2, 4  ;;  %s40_s27 = int_to_ptr.hbm [resolvable:$true] %s39_s27 }
   0x8   :  { %21 = vsyncpa [#allocation7], 0  ;;  %s536_s28 = smov [#allocation8]   ;;  %s26_s0 = sshll.u32 %s604_s1, 4  ;;  %s27_s0 = int_to_ptr.hbm [resolvable:$true] %s26_s0 }
   0x9   :  { %s41_s29 = sshll.u32 %s536_s28, 4  ;;  %s537_s8 = smov 64   ;;  %s42_s29 = int_to_ptr.vmem [resolvable:$true] %s41_s29 }
   0xa   :  { %s538_s9 = smov 4   ;;  %s539_s10 = smov [#allocation5]  }
   0xb   :  { %47 = dma.hbm_to_vmem [thread:$0]  %s40_s27, 1024, %s42_s29, [#allocation9], %s537_s8, %s537_s8, %s538_s9  }
   0xc   :  { %s28_s11 = sshll.u32 %s539_s10, 4  ;;  %s540_s12 = smov 128   ;;  %s29_s11 = int_to_ptr.vmem [resolvable:$true] %s28_s11 }
   0xd   :  { %s541_s13 = smov 8   ;;  %s54_s15 = sshll.u32 %s607_s4, 4  ;;  %s55_s15 = int_to_ptr.hbm [resolvable:$true] %s54_s15 }
   0xe   :  { %34 = dma.hbm_to_vmem [thread:$0]  %s27_s0, 896, %s29_s11, [#allocation6], %s540_s12, %s540_s12, %s541_s13  }
   0xf   :  { %s542_s16 = smov [#allocation10]  }
  0x10   :  { %s56_s17 = sshll.u32 %s542_s16, 4  ;;  %s57_s17 = int_to_ptr.vmem [resolvable:$true] %s56_s17 }
  0x11   :  { %62 = dma.hbm_to_vmem [thread:$0]  %s55_s15, 1024, %s57_s17, [#allocation9], %s537_s8, %s537_s8, %s538_s9  }
  0x12   :  { %529 = dma.done.wait [#allocation6], 896  }
  0x13   :  { %530 = vsyncadd [#allocation6], 4294966400 }
  0x14   :  { %531 = dma.done.wait [#allocation9], 2048  }
  0x15   :  { %532 = vsyncadd [#allocation9], 4294965248  ;;  %s77_s1 = sld [smem:[#allocation4]]  ;;  %v391_v0 = vld [vmem:[#allocation8 + $0x38] sm:$0xff]  ;;  %v390_v1 = vld [vmem:[#allocation8 + $0x30] sm:$0xff]  ;;  %s294_s2 = sshll.u32 %s609_s6, 4  ;;  %s295_s2 = int_to_ptr.hbm [resolvable:$true] %s294_s2 }
  0x16   :  { %s313_s18 = sld [smem:[#allocation4 + $0x1]]  ;;  %179 = vmatpush.bf16.msra.mxu0 %v391_v0  ;;  %v389_v5 = vld [vmem:[#allocation8 + $0x28] sm:$0xff]  ;;  %v399_v6 = vld [vmem:[#allocation10 + $0x38] sm:$0xff]  ;;  %v388_v12 = vld [vmem:[#allocation8 + $0x20] sm:$0xff] }
  0x17   :  { %s314_s19 = sld [smem:[#allocation4 + $0x2]]  ;;  %267 = vmatpush.bf16.msra.mxu1 %v399_v6  ;;  %v387_v13 = vld [vmem:[#allocation8 + $0x18] sm:$0xff]  ;;  %v386_v14 = vld [vmem:[#allocation8 + $0x10] sm:$0xff]  ;;  %v385_v15 = vld [vmem:[#allocation8 + $0x8] sm:$0xff] }
  0x18   :  { %s315_s20 = sld [smem:[#allocation4 + $0x3]]  ;;  %v384_v16 = vld [vmem:[#allocation8] sm:$0xff]  ;;  %v398_v19 = vld [vmem:[#allocation10 + $0x30] sm:$0xff]  ;;  %v397_v20 = vld [vmem:[#allocation10 + $0x28] sm:$0xff] }
  0x19   :  { %s316_s21 = sld [smem:[#allocation4 + $0x4]]  ;;  %v396_v21 = vld [vmem:[#allocation10 + $0x20] sm:$0xff]  ;;  %v395_v22 = vld [vmem:[#allocation10 + $0x18] sm:$0xff]  ;;  %v394_v23 = vld [vmem:[#allocation10 + $0x10] sm:$0xff] }
  0x1a   :  { %s317_s22 = sld [smem:[#allocation4 + $0x5]]  ;;  %180 = vmatpush.bf16.msra.mxu0 %v390_v1  ;;  %v393_v24 = vld [vmem:[#allocation10 + $0x8] sm:$0xff]  ;;  %v392_v25 = vld [vmem:[#allocation10] sm:$0xff] }
  0x1b   :  { %s318_s23 = sld [smem:[#allocation4 + $0x6]]  ;;  %s78_s4 = scalar_lea.vmem [#allocation5], %s77_s1  ;;  %268 = vmatpush.bf16.msra.mxu1 %v398_v19  ;;  %v409_v26 = vld [vmem:[%s606_s3] ss:$0 sm:$0xff] }
  0x1c   :  { %s591_s24 = sld [smem:[#allocation4 + $0x7]]  ;;  %v79_v2 = vld [vmem:[%s78_s4] sm:$0x1]  ;;  %s82_s25 = scalar_lea.vmem [#allocation5], %s313_s18 }
  0x1d   :  { %80 = vst [vmem:[#allocation2] sm:$0x1] %v79_v2  ;;  %v83_v3 = vld [vmem:[%s82_s25] sm:$0x1]  ;;  %s86_s26 = scalar_lea.vmem [#allocation5], %s314_s19  ;;  %s543_s3 = smov [#allocation11]  }
  0x1e   :  { %v87_v4 = vld [vmem:[%s86_s26] sm:$0x1]  ;;  %84 = vst [vmem:[#allocation2 + $0x1] sm:$0x1] %v83_v3  ;;  %s90_s27 = scalar_lea.vmem [#allocation5], %s315_s20  ;;  %181 = vmatpush.bf16.msra.mxu0 %v389_v5  ;;  %s292_s11 = sshll.u32 %s543_s3, 4  ;;  %s293_s11 = int_to_ptr.vmem [resolvable:$true] %s292_s11 }
  0x1f   :  { %88 = vst [vmem:[#allocation2 + $0x2] sm:$0x1] %v87_v4  ;;  %v91_v7 = vld [vmem:[%s90_s27] sm:$0x1]  ;;  %s94_s28 = scalar_lea.vmem [#allocation5], %s316_s21  ;;  %269 = vmatpush.bf16.msra.mxu1 %v397_v20 }
  0x20   :  { %v95_v8 = vld [vmem:[%s94_s28] sm:$0x1]  ;;  %92 = vst [vmem:[#allocation2 + $0x3] sm:$0x1] %v91_v7  ;;  %s98_s29 = scalar_lea.vmem [#allocation5], %s317_s22 }
  0x21   :  { %96 = vst [vmem:[#allocation2 + $0x4] sm:$0x1] %v95_v8  ;;  %v99_v9 = vld [vmem:[%s98_s29] sm:$0x1]  ;;  %s102_s30 = scalar_lea.vmem [#allocation5], %s318_s23 }
  0x22   :  { %v103_v10 = vld [vmem:[%s102_s30] sm:$0x1]  ;;  %100 = vst [vmem:[#allocation2 + $0x5] sm:$0x1] %v99_v9  ;;  %s106_s7 = scalar_lea.vmem [#allocation5], %s591_s24  ;;  %182 = vmatpush.bf16.msra.mxu0 %v388_v12 }
  0x23   :  { %104 = vst [vmem:[#allocation2 + $0x6] sm:$0x1] %v103_v10  ;;  %v107_v11 = vld [vmem:[%s106_s7] sm:$0x1]  ;;  %270 = vmatpush.bf16.msra.mxu1 %v396_v21 }
  0x24   :  { %108 = vst [vmem:[#allocation2 + $0x7] sm:$0x1] %v107_v11  ;;  %v410_v37 = vld [vmem:[%s608_s5] ss:$0 sm:$0xff] }
  0x26   :  { %183 = vmatpush.bf16.msra.mxu0 %v387_v13 }
  0x27   :  { %271 = vmatpush.bf16.msra.mxu1 %v395_v22 }
  0x2a   :  { %184 = vmatpush.bf16.msra.mxu0 %v386_v14 }
  0x2b   :  { %v109_v17 = vld [vmem:[#allocation2] sm:$0xff]  ;;  %272 = vmatpush.bf16.msra.mxu1 %v394_v23 }
  0x2c   :  { %v110_v18 = vpack.c.bf16 %v109_v17, %v109_v17 }
  0x2e   :  { %185 = vmatpush.bf16.msra.mxu0 %v385_v15 }
  0x2f   :  { %273 = vmatpush.bf16.msra.mxu1 %v393_v24 }
  0x32   :  { %186 = vmatpush.bf16.msra.mxu0 %v384_v16 }
  0x33   :  { %274 = vmatpush.bf16.msra.mxu1 %v392_v25 }
  0x35   :  { %187 = vmatmul.bf16.vlgmr.msra.gmra.mxu0 %v110_v18 }
  0xb2   :  { %v188_v27 = vpop.f32.mrf.mxu0 }
  0xb3   :  { %v189_v28 = vadd.f32 %v409_v26, %v188_v27 }
  0xb5   :  { %v192_v29 = vsub.f32 0.0, %v189_v28 }
  0xb7   :  { %v193_v30 = vmul.f32 1.442695, %v192_v29 }
  0xb9   :  { %411 = vpow2.f32 %v193_v30 }
  0xba   :  { %v190_v31 = vpop.f32.mrf.mxu0 }
  0xbf   :  { %v412_v32 = vpop.eup %411 }
  0xc0   :  { %v195_v33 = vadd.f32 1.0, %v412_v32 }
  0xc2   :  { %413 = vrcp.f32 %v195_v33 }
  0xc8   :  { %v414_v34 = vpop.eup %413 }
  0xc9   :  { %v197_v35 = vmul.f32 %v414_v34, %v189_v28 }
  0xcb   :  { %v198_v36 = vpack.c.bf16 %v197_v35, %v197_v35 }
  0xcd   :  { %275 = vmatmul.bf16.vlgmr.msra.gmra.mxu1 %v198_v36 }
 0x14a   :  { %v276_v38 = vpop.f32.mrf.mxu1 }
 0x14b   :  { %v277_v39 = vadd.f32 %v410_v37, %v276_v38 }
 0x14d   :  { %v280_v40 = vsub.f32 0.0, %v277_v39 }
 0x14f   :  { %v281_v41 = vmul.f32 1.442695, %v280_v40 }
 0x151   :  { %415 = vpow2.f32 %v281_v41 }
 0x152   :  { %v278_v42 = vpop.f32.mrf.mxu1 }
 0x157   :  { %v416_v43 = vpop.eup %415 }
 0x158   :  { %v283_v44 = vadd.f32 1.0, %v416_v43 }
 0x15a   :  { %417 = vrcp.f32 %v283_v44 }
 0x160   :  { %v418_v45 = vpop.eup %417 }
 0x161   :  { %v285_v46 = vmul.f32 %v418_v45, %v277_v39 }
 0x163   :  { %286 = vst [vmem:[#allocation11] sm:$0xff] %v285_v46 }
 0x164   :  { %297 = dma.vmem_to_hbm [thread:$0]  %s293_s11, 128, %s295_s2, [#allocation7]  }
 0x165   :  { %533 = dma.done.wait [#allocation7], 128  }
 0x166   :  { %534 = vsyncadd [#allocation7], 4294967168 }
 0x167   :  { %302 = vsyncpa [#allocation6], 1 }
 0x168   :  { %303 = vsyncpa [#allocation9], 1 }
 0x169   :  { %304 = vsyncpa [#allocation7], 1 }

</bundles_post_ra>
